<compile_context>
chip_gen: v5e
topology: v5e:2x2
jax: 0.10.0
libtpu: 0.0.40
codegen_flags: <defaults>
</compile_context>

<pallas_src>
import math

import jax
import jax.numpy as jnp
from jax.experimental import pallas as pl
from jax.experimental.pallas import tpu as pltpu


def _round_up(n, m):
    return ((n + m - 1) // m) * m


# ---------------------------------------------------------------------------
# Kernel
# ---------------------------------------------------------------------------
def _fused_mlp_kernel(x_ref, w1_ref, w2_ref, w3_ref, bias_ref, out_ref):
    """Per-batch-tile fused forward: 3 MXU matmuls (bf16 in, f32 acc) + 2 tanh."""
    w_pad = w1_ref.shape[1]
    lanes = w3_ref.shape[1]

    b1 = bias_ref[0:1, :w_pad]                          # (1, w_pad) f32
    b2 = bias_ref[1:2, :w_pad]                          # (1, w_pad) f32
    b3 = bias_ref[2:3, :lanes]                          # (1, lanes) f32

    x = x_ref[...].astype(jnp.bfloat16)                 # (TB, D_in)
    h1 = jnp.tanh(
        jnp.dot(x, w1_ref[...], preferred_element_type=jnp.float32) + b1)
    h2 = jnp.tanh(
        jnp.dot(h1.astype(jnp.bfloat16), w2_ref[...],
                preferred_element_type=jnp.float32) + b2)
    val = (jnp.dot(h2.astype(jnp.bfloat16), w3_ref[...],
                   preferred_element_type=jnp.float32) + b3)

    # Single lane-dense output slab: [hidden activations | value heads].
    out_ref[:, :w_pad] = h2
    out_ref[:, w_pad:] = val


# ---------------------------------------------------------------------------
# Host-side weight fusion (one-time)
# ---------------------------------------------------------------------------
def pack_params(p):
    """Fuse per-trunk Linear weights into three lane-dense bf16 matrices."""
    aw1, ab1, aw2, ab2 = p["aw1"], p["ab1"], p["aw2"], p["ab2"]
    cw1, cb1, cw2, cb2, cw3, cb3 = (
        p["cw1"], p["cb1"], p["cw2"], p["cb2"], p["cw3"], p["cb3"])
    D_in, H = aw1.shape
    n_heads = cw1.shape[0]                    # 1 main critic + comm_size aux
    w_tot = (1 + n_heads) * H                 # actor trunk + all critic trunks
    w_pad = _round_up(w_tot, 128)             # lane-dense hidden width
    lanes = _round_up(n_heads, 128)           # lane-dense value-head width
    maxw = max(w_pad, lanes)

    # Layer 1: concat along output dim, zero-pad -> (D_in, w_pad)
    W1 = jnp.zeros((D_in, w_pad), jnp.float32)
    W1 = W1.at[:, :w_tot].set(
        jnp.concatenate([aw1] + [cw1[i] for i in range(n_heads)], axis=1))

    # Layer 2: block diagonal -> (w_pad, w_pad)
    W2 = jnp.zeros((w_pad, w_pad), jnp.float32).at[:H, :H].set(aw2)
    for i in range(n_heads):
        lo = (1 + i) * H
        W2 = W2.at[lo:lo + H, lo:lo + H].set(cw2[i])

    # Layer 3: one lane column per critic head -> (w_pad, lanes)
    W3 = jnp.zeros((w_pad, lanes), jnp.float32)
    for i in range(n_heads):
        lo = (1 + i) * H
        W3 = W3.at[lo:lo + H, i].set(cw3[i][:, 0])

    # All biases fused into one (3, maxw) f32 array (rows: b1, b2, b3).
    b1_row = jnp.concatenate([ab1[0]] + [cb1[i, 0] for i in range(n_heads)])
    b2_row = jnp.concatenate([ab2[0]] + [cb2[i, 0] for i in range(n_heads)])
    b3_row = jnp.concatenate([cb3[i, 0] for i in range(n_heads)])
    bias = jnp.zeros((3, maxw), jnp.float32)
    bias = bias.at[0, :w_tot].set(b1_row)
    bias = bias.at[1, :w_tot].set(b2_row)
    bias = bias.at[2, :n_heads].set(b3_row)

    return {
        "W1": W1.astype(jnp.bfloat16),
        "W2": W2.astype(jnp.bfloat16),
        "W3": W3.astype(jnp.bfloat16),
        "bias": bias,
        "w_pad": w_pad,
        "lanes": lanes,
        "hidden_size": H,
        "num_heads": n_heads,
    }


# ---------------------------------------------------------------------------
# Forward wrappers
# ---------------------------------------------------------------------------
def mlp_base_forward(x, packed):
    """Fused MLPBase forward. Returns (value (B,1), [aux_i (B,1)], actor (B,H))."""
    B, D_in = x.shape
    w_pad, lanes = packed["w_pad"], packed["lanes"]
    hidden, num_heads = packed["hidden_size"], packed["num_heads"]
    out_w = w_pad + lanes

    # Row tile: multiple of 8, up to 512 rows per grid step.
    TB = min(512, _round_up(B, 8))
    B_pad = _round_up(B, TB)
    if B_pad != B:
        x = jnp.pad(x, ((0, B_pad - B), (0, 0)))
    grid = (B_pad // TB,)

    bytes_accessed = int(
        4 * (B_pad * D_in + packed["bias"].size + B_pad * out_w) +
        2 * (packed["W1"].size + packed["W2"].size + packed["W3"].size))
    cost = pl.CostEstimate(
        flops=int(2 * B_pad * (D_in * w_pad + w_pad * w_pad + w_pad * lanes)),
        transcendentals=int(2 * B_pad * w_pad),
        bytes_accessed=bytes_accessed,
    )

    slab = pl.pallas_call(
        _fused_mlp_kernel,
        out_shape=jax.ShapeDtypeStruct((B_pad, out_w), jnp.float32),
        grid=grid,
        in_specs=[
            pl.BlockSpec((TB, D_in), lambda i: (i, 0)),          # x: batch-tiled
            pl.BlockSpec((D_in, w_pad), lambda i: (0, 0)),        # W1: resident
            pl.BlockSpec((w_pad, w_pad), lambda i: (0, 0)),       # W2: resident
            pl.BlockSpec((w_pad, lanes), lambda i: (0, 0)),       # W3: resident
            pl.BlockSpec(packed["bias"].shape, lambda i: (0, 0)), # biases
        ],
        out_specs=pl.BlockSpec((TB, out_w), lambda i: (i, 0)),
        compiler_params=pltpu.CompilerParams(
            dimension_semantics=("parallel",)),
        cost_estimate=cost,
    )(x, packed["W1"], packed["W2"], packed["W3"], packed["bias"])

    slab = slab[:B]
    actor_features = slab[:, :hidden]
    heads = slab[:, w_pad:w_pad + num_heads]   # one slice for all value heads
    value = heads[:, 0:1]
    aux_values = [heads[:, i:i + 1] for i in range(1, num_heads)]
    return value, aux_values, actor_features


def actor_critic_base(inputs, rnn_hxs, masks, packed):
    """Mirrors MLPBase.forward: (value, aux_values, actor_features, rnn_hxs)."""
    del masks  # unused (non-recurrent)
    value, aux_values, actor_features = mlp_base_forward(inputs, packed)
    return value, aux_values, actor_features, rnn_hxs


# ---------------------------------------------------------------------------
# Parameter init (matches PyTorch shapes/init) and pure-JAX f32 reference
# ---------------------------------------------------------------------------
def init_params(key, num_inputs, hidden_size, comm_size):
    """Orthogonal(gain=sqrt(2)) weights, zero biases; weights stored (in, out)."""
    gain = math.sqrt(2.0)
    ortho = jax.nn.initializers.orthogonal(scale=gain)
    C = 1 + comm_size  # main critic + aux critics

    keys = jax.random.split(key, 2 + 3 * C)
    p = {
        "aw1": ortho(keys[0], (num_inputs, hidden_size), jnp.float32),
        "ab1": jnp.zeros((1, hidden_size), jnp.float32),
        "aw2": ortho(keys[1], (hidden_size, hidden_size), jnp.float32),
        "ab2": jnp.zeros((1, hidden_size), jnp.float32),
    }
    cw1, cw2, cw3 = [], [], []
    for i in range(C):
        cw1.append(ortho(keys[2 + 3 * i + 0], (num_inputs, hidden_size), jnp.float32))
        cw2.append(ortho(keys[2 + 3 * i + 1], (hidden_size, hidden_size), jnp.float32))
        cw3.append(ortho(keys[2 + 3 * i + 2], (hidden_size, 1), jnp.float32))
    p["cw1"] = jnp.stack(cw1)                         # (C, D_in, H)
    p["cb1"] = jnp.zeros((C, 1, hidden_size), jnp.float32)
    p["cw2"] = jnp.stack(cw2)                         # (C, H, H)
    p["cb2"] = jnp.zeros((C, 1, hidden_size), jnp.float32)
    p["cw3"] = jnp.stack(cw3)                         # (C, H, 1)
    p["cb3"] = jnp.zeros((C, 1, 1), jnp.float32)
    return p


def _reference(x, params):
    """Pure-JAX f32 reference of MLPBase.forward for verification."""
    h = jnp.tanh(x @ params["aw1"] + params["ab1"])
    actor = jnp.tanh(h @ params["aw2"] + params["ab2"])
    vals = []
    for i in range(params["cw1"].shape[0]):
        c = jnp.tanh(x @ params["cw1"][i] + params["cb1"][i])
        c = jnp.tanh(c @ params["cw2"][i] + params["cb2"][i])
        vals.append(c @ params["cw3"][i] + params["cb3"][i])
    return vals[0], vals[1:], actor


if __name__ == "__main__":
    B, D_IN, HIDDEN, COMM = 8, 16, 32, 2
    NUM_HEADS = 1 + COMM                     # fused width = (1+NUM_HEADS)*HIDDEN = 128

    key = jax.random.PRNGKey(0)
    k_param, k_x = jax.random.split(key)
    raw_params = init_params(k_param, D_IN, HIDDEN, COMM)
    packed = pack_params(raw_params)          # one-time host-side weight fusion
    x = jax.random.normal(k_x, (B, D_IN), jnp.float32)
    rnn_hxs = jnp.zeros((B, 1), jnp.float32)  # recurrent_hidden_state_size == 1
    masks = jnp.ones((B, 1), jnp.float32)

    value, aux_values, actor_features, rnn_out = actor_critic_base(
        x, rnn_hxs, masks, packed)
    jax.block_until_ready((value, aux_values, actor_features, rnn_out))

    # Sanity-check against the pure-f32 reference.  Weights are stored bf16 in
    # the kernel (accumulation stays f32), so the tolerance is relaxed
    # explicitly per the correctness review.
    ref_v, ref_aux, ref_actor = _reference(x, raw_params)
    assert value.shape == (B, 1) and actor_features.shape == (B, HIDDEN)
    assert len(aux_values) == COMM
    assert jnp.allclose(value, ref_v, atol=3e-2)
    assert all(jnp.allclose(a, r, atol=3e-2) for a, r in zip(aux_values, ref_aux))
    assert jnp.allclose(actor_features, ref_actor, atol=3e-2)
    assert jnp.array_equal(rnn_out, rnn_hxs)

    print("KERNEL_OK")
</pallas_src>

<mosaic_0001>
module attributes {stable_mosaic.version = 11 : i64} {
  func.func @_fused_mlp_kernel(%arg0: i32, %arg1: memref<8x16xf32, #tpu.memory_space<vmem>>, %arg2: memref<16x128xbf16, #tpu.memory_space<vmem>>, %arg3: memref<128x128xbf16, #tpu.memory_space<vmem>>, %arg4: memref<128x128xbf16, #tpu.memory_space<vmem>>, %arg5: memref<3x128xf32, #tpu.memory_space<vmem>>, %arg6: memref<8x256xf32, #tpu.memory_space<vmem>>) attributes {dimension_semantics = [#tpu.dimension_semantics<parallel>], iteration_bounds = array<i64: 1>, scalar_prefetch = 0 : i64, scratch_operands = 0 : i64, tpu.core_type = #tpu.core_type<tc>, window_params = [{transform_indices = @transform_0, window_bounds = array<i64: 8, 16>}, {pipeline_mode = #tpu.pipeline_mode<synchronous>, transform_indices = @transform_1, window_bounds = array<i64: 16, 128>}, {pipeline_mode = #tpu.pipeline_mode<synchronous>, transform_indices = @transform_2, window_bounds = array<i64: 128, 128>}, {pipeline_mode = #tpu.pipeline_mode<synchronous>, transform_indices = @transform_3, window_bounds = array<i64: 128, 128>}, {pipeline_mode = #tpu.pipeline_mode<synchronous>, transform_indices = @transform_4, window_bounds = array<i64: 3, 128>}, {transform_indices = @transform_5, window_bounds = array<i64: 8, 256>}]} {
    %c0 = arith.constant 0 : index
    %c0_0 = arith.constant 0 : index
    %0 = vector.load %arg5[%c0, %c0_0] : memref<3x128xf32, #tpu.memory_space<vmem>>, vector<1x128xf32>
    %c1 = arith.constant 1 : index
    %c0_1 = arith.constant 0 : index
    %1 = vector.load %arg5[%c1, %c0_1] : memref<3x128xf32, #tpu.memory_space<vmem>>, vector<1x128xf32>
    %c2 = arith.constant 2 : index
    %c0_2 = arith.constant 0 : index
    %2 = vector.load %arg5[%c2, %c0_2] : memref<3x128xf32, #tpu.memory_space<vmem>>, vector<1x128xf32>
    %c0_3 = arith.constant 0 : index
    %c0_4 = arith.constant 0 : index
    %3 = vector.load %arg1[%c0_3, %c0_4] : memref<8x16xf32, #tpu.memory_space<vmem>>, vector<8x16xf32>
    %4 = arith.truncf %3 : vector<8x16xf32> to vector<8x16xbf16>
    %c0_5 = arith.constant 0 : index
    %c0_6 = arith.constant 0 : index
    %5 = vector.load %arg2[%c0_5, %c0_6] : memref<16x128xbf16, #tpu.memory_space<vmem>>, vector<16x128xbf16>
    %cst = arith.constant dense<0.000000e+00> : vector<8x128xf32>
    %6 = tpu.matmul %4, %5, %cst {dimension_numbers = #tpu.dot_dimension_numbers<[1], [0], [0], [1], [0, 0, 1, 1], [], []>} : vector<8x16xbf16>, vector<16x128xbf16>, vector<8x128xf32> -> vector<8x128xf32>
    %7 = vector.broadcast %0 : vector<1x128xf32> to vector<8x128xf32>
    %8 = arith.addf %6, %7 : vector<8x128xf32>
    %9 = math.tanh %8 : vector<8x128xf32>
    %10 = arith.truncf %9 : vector<8x128xf32> to vector<8x128xbf16>
    %c0_7 = arith.constant 0 : index
    %c0_8 = arith.constant 0 : index
    %11 = vector.load %arg3[%c0_7, %c0_8] : memref<128x128xbf16, #tpu.memory_space<vmem>>, vector<128x128xbf16>
    %cst_9 = arith.constant dense<0.000000e+00> : vector<8x128xf32>
    %12 = tpu.matmul %10, %11, %cst_9 {dimension_numbers = #tpu.dot_dimension_numbers<[1], [0], [0], [1], [0, 0, 1, 1], [], []>} : vector<8x128xbf16>, vector<128x128xbf16>, vector<8x128xf32> -> vector<8x128xf32>
    %13 = vector.broadcast %1 : vector<1x128xf32> to vector<8x128xf32>
    %14 = arith.addf %12, %13 : vector<8x128xf32>
    %15 = math.tanh %14 : vector<8x128xf32>
    %16 = arith.truncf %15 : vector<8x128xf32> to vector<8x128xbf16>
    %c0_10 = arith.constant 0 : index
    %c0_11 = arith.constant 0 : index
    %17 = vector.load %arg4[%c0_10, %c0_11] : memref<128x128xbf16, #tpu.memory_space<vmem>>, vector<128x128xbf16>
    %cst_12 = arith.constant dense<0.000000e+00> : vector<8x128xf32>
    %18 = tpu.matmul %16, %17, %cst_12 {dimension_numbers = #tpu.dot_dimension_numbers<[1], [0], [0], [1], [0, 0, 1, 1], [], []>} : vector<8x128xbf16>, vector<128x128xbf16>, vector<8x128xf32> -> vector<8x128xf32>
    %19 = vector.broadcast %2 : vector<1x128xf32> to vector<8x128xf32>
    %20 = arith.addf %18, %19 : vector<8x128xf32>
    %c0_13 = arith.constant 0 : index
    %c0_14 = arith.constant 0 : index
    %21 = vector.load %arg6[%c0_13, %c0_14] : memref<8x256xf32, #tpu.memory_space<vmem>>, vector<8x128xf32>
    tpu.vector_store %arg6[%c0_13, %c0_14], %15 {strides = array<i32>} : memref<8x256xf32, #tpu.memory_space<vmem>>, vector<8x128xf32>,
    %c0_15 = arith.constant 0 : index
    %c128 = arith.constant 128 : index
    %22 = vector.load %arg6[%c0_15, %c128] : memref<8x256xf32, #tpu.memory_space<vmem>>, vector<8x128xf32>
    tpu.vector_store %arg6[%c0_15, %c128], %20 {strides = array<i32>} : memref<8x256xf32, #tpu.memory_space<vmem>>, vector<8x128xf32>,
    return
  }
  func.func @transform_0(%arg0: i32) -> (i32, i32) {
    %c0_i32 = arith.constant 0 : i32
    %c0_i32_0 = arith.constant 0 : i32
    return %arg0, %c0_i32 : i32, i32
  }
  func.func @transform_1(%arg0: i32) -> (i32, i32) {
    %c0_i32 = arith.constant 0 : i32
    %c0_i32_0 = arith.constant 0 : i32
    %c0_i32_1 = arith.constant 0 : i32
    return %c0_i32, %c0_i32_0 : i32, i32
  }
  func.func @transform_2(%arg0: i32) -> (i32, i32) {
    %c0_i32 = arith.constant 0 : i32
    %c0_i32_0 = arith.constant 0 : i32
    %c0_i32_1 = arith.constant 0 : i32
    return %c0_i32, %c0_i32_0 : i32, i32
  }
  func.func @transform_3(%arg0: i32) -> (i32, i32) {
    %c0_i32 = arith.constant 0 : i32
    %c0_i32_0 = arith.constant 0 : i32
    %c0_i32_1 = arith.constant 0 : i32
    return %c0_i32, %c0_i32_0 : i32, i32
  }
  func.func @transform_4(%arg0: i32) -> (i32, i32) {
    %c0_i32 = arith.constant 0 : i32
    %c0_i32_0 = arith.constant 0 : i32
    %c0_i32_1 = arith.constant 0 : i32
    return %c0_i32, %c0_i32_0 : i32, i32
  }
  func.func @transform_5(%arg0: i32) -> (i32, i32) {
    %c0_i32 = arith.constant 0 : i32
    %c0_i32_0 = arith.constant 0 : i32
    return %arg0, %c0_i32 : i32, i32
  }
}

</mosaic_0001>

<bundles_post_ra>
// kernel: tpu_custom_call.1
= control target key start
LH: loop header
LB: loop body
LE: loop exit
PB: predicated region body
PF: predicated region fallthrough
CT: control target
= control target key end

     0   :  { %10 = vsyncpa [#allocation3], 0  ;;  %s617_s0 = inlined_call_operand.hbm [shape: f32[8,16], index: 0, kind: input, shape index: {}]   ;;  %s618_s1 = inlined_call_operand.hbm [shape: bf16[16,128], index: 1, kind: input, shape index: {}]   ;;  %s619_s2 = inlined_call_operand.hbm [shape: bf16[128,128], index: 2, kind: input, shape index: {}]   ;;  %s620_s3 = inlined_call_operand.hbm [shape: bf16[128,128], index: 3, kind: input, shape index: {}]   ;;  %s621_s4 = inlined_call_operand.hbm [shape: f32[3,128], index: 4, kind: input, shape index: {}]   ;;  %s622_s5 = inlined_call_operand.hbm [shape: f32[8,256], index: 5, kind: output, shape index: {}]  }
   0x1   :  { %11 = vsyncpa [#allocation6], 0 }
   0x2   :  { %12 = vsyncpa [#allocation9], 0  ;;  %s29_s20 = sshll.u32 %s618_s1, 4  ;;  %s30_s20 = int_to_ptr.hbm [resolvable:$true] %s29_s20 }
   0x3   :  { %13 = vsyncpa [#allocation4], 0  ;;  %s561_s21 = smov [#allocation5]   ;;  %s55_s25 = sshll.u32 %s620_s3, 4  ;;  %s56_s25 = int_to_ptr.hbm [resolvable:$true] %s55_s25 }
   0x4   :  { %s31_s22 = sshll.u32 %s561_s21, 4  ;;  %s562_s26 = smov 64   ;;  %s32_s22 = int_to_ptr.vmem [resolvable:$true] %s31_s22 }
   0x5   :  { %s563_s27 = smov 4   ;;  %s564_s28 = smov [#allocation8]  }
   0x6   :  { %37 = dma.hbm_to_vmem [thread:$0]  %s30_s20, 128, %s32_s22, [#allocation6], %s562_s26, %s562_s26, %s563_s27  }
   0x7   :  { %s57_s29 = sshll.u32 %s564_s28, 4  ;;  %s19_s7 = sshll.u32 %s617_s0, 4  ;;  %s58_s29 = int_to_ptr.vmem [resolvable:$true] %s57_s29  ;;  %s20_s7 = int_to_ptr.hbm [resolvable:$true] %s19_s7 }
   0x8   :  { %63 = dma.hbm_to_vmem [thread:$0]  %s56_s25, 1024, %s58_s29, [#allocation9], %s562_s26, %s562_s26, %s563_s27  }
   0x9   :  { %s42_s9 = sshll.u32 %s619_s2, 4  ;;  %s565_s10 = smov [#allocation2]   ;;  %s43_s9 = int_to_ptr.hbm [resolvable:$true] %s42_s9 }
   0xa   :  { %s21_s11 = sshll.u32 %s565_s10, 4  ;;  %s566_s3 = smov [#allocation7]   ;;  %s22_s11 = int_to_ptr.vmem [resolvable:$true] %s21_s11 }
   0xb   :  { %24 = dma.hbm_to_vmem [thread:$0]  %s20_s7, 128, %s22_s11, [#allocation3]  }
   0xc   :  { %s44_s12 = sshll.u32 %s566_s3, 4  ;;  %s69_s15 = sshll.u32 %s621_s4, 4  ;;  %s45_s12 = int_to_ptr.vmem [resolvable:$true] %s44_s12  ;;  %s70_s15 = int_to_ptr.hbm [resolvable:$true] %s69_s15 }
   0xd   :  { %50 = dma.hbm_to_vmem [thread:$0]  %s43_s9, 1024, %s45_s12, [#allocation6], %s562_s26, %s562_s26, %s563_s27  }
   0xe   :  { %s567_s0 = smov [#allocation10]  }
   0xf   :  { %s71_s16 = sshll.u32 %s567_s0, 4  ;;  %s72_s16 = int_to_ptr.vmem [resolvable:$true] %s71_s16 }
  0x10   :  { %74 = dma.hbm_to_vmem [thread:$0]  %s70_s15, 64, %s72_s16, [#allocation9]  }
  0x11   :  { %553 = dma.done.wait [#allocation3], 128  }
  0x12   :  { %554 = vsyncadd [#allocation3], 4294967168 }
  0x13   :  { %555 = dma.done.wait [#allocation6], 1152  }
  0x14   :  { %556 = vsyncadd [#allocation6], 4294966144 }
  0x15   :  { %557 = dma.done.wait [#allocation9], 1088  }
  0x16   :  { %558 = vsyncadd [#allocation9], 4294966208  ;;  %v377_v0 = vld [vmem:[#allocation5] sm:$0xff]  ;;  %v99_v1 = vld [vmem:[#allocation2] sm:$0xff]  ;;  %vm110_vm0 = vcmask 130048   ;;  %s568_s2 = smov [#allocation11]  }
  0x17   :  { %v385_v2 = vld [vmem:[#allocation7 + $0x38] sm:$0xff]  ;;  %v100_v3 = vpack.c.bf16 %v99_v1, %v99_v1  ;;  %121 = vmatpush.bf16.msra.mxu0 %v377_v0  ;;  %v384_v4 = vld [vmem:[#allocation7 + $0x30] sm:$0xff]  ;;  %v383_v5 = vld [vmem:[#allocation7 + $0x28] sm:$0xff]  ;;  %s294_s4 = sshll.u32 %s568_s2, 4  ;;  %s296_s19 = sshll.u32 %s622_s5, 4  ;;  %s295_s4 = int_to_ptr.vmem [resolvable:$true] %s294_s4  ;;  %s297_s19 = int_to_ptr.hbm [resolvable:$true] %s296_s19 }
  0x18   :  { %194 = vmatpush.bf16.msra.mxu1 %v385_v2  ;;  %v382_v6 = vld [vmem:[#allocation7 + $0x20] sm:$0xff]  ;;  %v381_v7 = vld [vmem:[#allocation7 + $0x18] sm:$0xff]  ;;  %v380_v8 = vld [vmem:[#allocation7 + $0x10] sm:$0xff] }
  0x19   :  { %v379_v9 = vld [vmem:[#allocation7 + $0x8] sm:$0xff]  ;;  %v378_v10 = vld [vmem:[#allocation7] sm:$0xff]  ;;  %v393_v11 = vld [vmem:[#allocation8 + $0x38] sm:$0xff] }
  0x1a   :  { %312 = vmatmul.msk.bf16.vlgmr.msra.gmra.mxu0 %vm110_vm0, %v100_v3  ;;  %274 = vmatpush.bf16.msra.mxu2 %v393_v11  ;;  %v392_v12 = vld [vmem:[#allocation8 + $0x30] sm:$0xff]  ;;  %v391_v13 = vld [vmem:[#allocation8 + $0x28] sm:$0xff]  ;;  %v390_v14 = vld [vmem:[#allocation8 + $0x20] sm:$0xff] }
  0x1b   :  { %v389_v15 = vld [vmem:[#allocation8 + $0x18] sm:$0xff]  ;;  %v402_v16 = vld [vmem:[#allocation10] ss:$0 sm:$0xff]  ;;  %v388_v22 = vld [vmem:[#allocation8 + $0x10] sm:$0xff] }
  0x1c   :  { %195 = vmatpush.bf16.msra.mxu1 %v384_v4  ;;  %v387_v23 = vld [vmem:[#allocation8 + $0x8] sm:$0xff]  ;;  %v386_v24 = vld [vmem:[#allocation8] sm:$0xff] }
  0x1d   :  { %v403_v25 = vld [vmem:[#allocation10 + $0x1] ss:$0 sm:$0xff]  ;;  %v404_v31 = vld [vmem:[#allocation10 + $0x2] ss:$0 sm:$0xff] }
  0x1e   :  { %275 = vmatpush.bf16.msra.mxu2 %v392_v12 }
  0x20   :  { %196 = vmatpush.bf16.msra.mxu1 %v383_v5 }
  0x22   :  { %276 = vmatpush.bf16.msra.mxu2 %v391_v13 }
  0x24   :  { %197 = vmatpush.bf16.msra.mxu1 %v382_v6 }
  0x26   :  { %277 = vmatpush.bf16.msra.mxu2 %v390_v14 }
  0x28   :  { %198 = vmatpush.bf16.msra.mxu1 %v381_v7 }
  0x2a   :  { %278 = vmatpush.bf16.msra.mxu2 %v389_v15 }
  0x2c   :  { %199 = vmatpush.bf16.msra.mxu1 %v380_v8 }
  0x2e   :  { %279 = vmatpush.bf16.msra.mxu2 %v388_v22 }
  0x30   :  { %200 = vmatpush.bf16.msra.mxu1 %v379_v9 }
  0x32   :  { %280 = vmatpush.bf16.msra.mxu2 %v387_v23 }
  0x34   :  { %201 = vmatpush.bf16.msra.mxu1 %v378_v10 }
  0x36   :  { %281 = vmatpush.bf16.msra.mxu2 %v386_v24 }
  0x97   :  { %v123_v17 = vpop.f32.mrf.mxu0 }
  0x98   :  { %v124_v18 = vadd.f32 %v402_v16, %v123_v17 }
  0x9a   :  { %405 = vtanh.f32 %v124_v18 }
  0x9f   :  { %v125_v19 = vpop.f32.mrf.mxu0 }
  0xa0   :  { %v406_v20 = vpop.eup %405 }
  0xa1   :  { %v128_v21 = vpack.c.bf16 %v406_v20, %v406_v20 }
  0xa3   :  { %202 = vmatmul.bf16.vlgmr.msra.gmra.mxu1 %v128_v21 }
 0x120   :  { %v203_v26 = vpop.f32.mrf.mxu1 }
 0x121   :  { %v204_v27 = vadd.f32 %v403_v25, %v203_v26 }
 0x123   :  { %407 = vtanh.f32 %v204_v27 }
 0x128   :  { %v205_v28 = vpop.f32.mrf.mxu1 }
 0x129   :  { %v408_v29 = vpop.eup %407 }
 0x12a   :  { %287 = vst [vmem:[#allocation11] sm:$0xff] %v408_v29  ;;  %v208_v30 = vpack.c.bf16 %v408_v29, %v408_v29 }
 0x12c   :  { %282 = vmatmul.bf16.vlgmr.msra.gmra.mxu2 %v208_v30 }
 0x1af   :  { %v283_v32 = vpop.f32.mrf.mxu2 }
 0x1b0   :  { %v284_v33 = vadd.f32 %v404_v31, %v283_v32 }
 0x1b2   :  { %288 = vst [vmem:[#allocation11 + $0x8] sm:$0xff] %v284_v33 }
 0x1b3   :  { %299 = dma.vmem_to_hbm [thread:$0]  %s295_s4, 256, %s297_s19, [#allocation4]  }
 0x1b7   :  { %v285_v34 = vpop.f32.mrf.mxu2 }
 0x1b8   :  { %559 = dma.done.wait [#allocation4], 256  }
 0x1b9   :  { %560 = vsyncadd [#allocation4], 4294967040 }
 0x1ba   :  { %304 = vsyncpa [#allocation3], 1 }
 0x1bb   :  { %305 = vsyncpa [#allocation6], 1 }
 0x1bc   :  { %306 = vsyncpa [#allocation9], 1 }
 0x1bd   :  { %307 = vsyncpa [#allocation4], 1 }

</bundles_post_ra>
